<compile_context>
chip_gen: v7x
topology: tpu7x:2x2x1
jax: 0.10.0
libtpu: 0.0.40
codegen_flags: <defaults>
</compile_context>

<pallas_src>
import jax
import jax.numpy as jnp
from jax.experimental import pallas as pl
from jax.experimental.pallas import tpu as pltpu

EPS = 1e-5  # PyTorch BatchNorm1d default eps


# ----------------------------- Pallas kernel ------------------------------

def _fused_kernel(x_ref, w1c_ref, w2b_ref, w2m_ref, p1_ref, g_ref, b_ref,
                  p2_ref, q_ref, k_ref):
    """Fused: base encoder -> predictor (q) and momentum encoder (k).

    x_ref   : [B, Din]      f32  (cast to bf16 in-kernel)
    w1c_ref : [Din, 2*Dh]   bf16  (concat of base W1 | momentum W1)
    w2b_ref : [Dh, D]       bf16  (base encoder W2)
    w2m_ref : [Dh, D]       bf16  (momentum encoder W2)
    p1_ref  : [D, M]        bf16  (predictor W1)
    g_ref   : [1, M]        f32   (BN1 gamma)
    b_ref   : [1, M]        f32   (BN1 beta)
    p2_ref  : [M, D]        bf16  (predictor W2)
    q_ref   : [B, D]        f32 out
    k_ref   : [B, D]        f32 out
    """
    Dh = w2b_ref.shape[0]

    # --- both encoders' first layer in one MXU pass (concat along N) ---
    xb = x_ref[...].astype(jnp.bfloat16)          # in-kernel cast (VPU, free)
    h = jnp.dot(xb, w1c_ref[...], preferred_element_type=jnp.float32)
    h = jnp.maximum(h, 0.0)                       # ReLU in f32
    hb = h[:, :Dh].astype(jnp.bfloat16)           # base-encoder hidden
    hm = h[:, Dh:].astype(jnp.bfloat16)           # momentum-encoder hidden

    f_base = jnp.dot(hb, w2b_ref[...], preferred_element_type=jnp.float32)
    k_ref[...] = jnp.dot(hm, w2m_ref[...], preferred_element_type=jnp.float32)

    # --- predictor: Linear -> BN(gamma,beta) -> ReLU -> Linear -> BN ---
    z1 = jnp.dot(f_base.astype(jnp.bfloat16), p1_ref[...],
                 preferred_element_type=jnp.float32)
    mu1 = jnp.mean(z1, axis=0, keepdims=True)
    c1 = z1 - mu1                                  # centered (variance only)
    var1 = jnp.mean(c1 * c1, axis=0, keepdims=True)
    # fold BN1 scale/shift into [1,M] row ops; [B,M] work = 1 mul + 1 add
    s1 = g_ref[...] * jax.lax.rsqrt(var1 + EPS)
    t1 = b_ref[...] - mu1 * s1
    hr = jnp.maximum(z1 * s1 + t1, 0.0)

    z2 = jnp.dot(hr.astype(jnp.bfloat16), p2_ref[...],
                 preferred_element_type=jnp.float32)
    mu2 = jnp.mean(z2, axis=0, keepdims=True)
    c2 = z2 - mu2
    var2 = jnp.mean(c2 * c2, axis=0, keepdims=True)
    q_ref[...] = c2 * jax.lax.rsqrt(var2 + EPS)    # BN without affine


# ------------------------- one-time parameter prep -------------------------

def prepare_params(params):
    """One-time device-side weight preparation (hoisted out of the step).

    Concatenates base/momentum W1 and casts matmul weights to bf16 exactly
    once; the returned arrays stay resident in HBM and are reused by every
    forward call (no per-step copy/convert launches).
    """
    bf = jnp.bfloat16
    Dh = params["enc_w1"].shape[1]
    D = params["enc_w2"].shape[1]
    M = params["pred_w1"].shape[1]
    assert Dh % 128 == 0, "hidden width must be a multiple of 128 (lane split)"
    assert D % 128 == 0, "embedding dim must be a multiple of 128"
    assert M % 128 == 0, "predictor mlp_dim must be a multiple of 128"
    return {
        "w1c": jnp.concatenate([params["enc_w1"], params["mom_w1"]],
                               axis=1).astype(bf),          # [Din, 2*Dh]
        "w2b": params["enc_w2"].astype(bf),                 # [Dh, D]
        "w2m": params["mom_w2"].astype(bf),                 # [Dh, D]
        "p1": params["pred_w1"].astype(bf),                 # [D, M]
        "p2": params["pred_w2"].astype(bf),                 # [M, D]
        "g": params["bn1_gamma"].astype(jnp.float32).reshape(1, M),
        "b": params["bn1_beta"].astype(jnp.float32).reshape(1, M),
    }


# ----------------------------- host wrapper -------------------------------

_VMEM = pl.BlockSpec(memory_space=pltpu.MemorySpace.VMEM)


def contrast_momentum_forward(x_nchw, prepared, k=True, q=True):
    """Mirrors ContrastMomentum.forward(x, k, q) -> (q, k).

    `prepared` comes from prepare_params (one-time).  The fused kernel always
    computes both branches (they share the input DMA and the first-layer
    matmul); disabled outputs are simply dropped.
    """
    B = x_nchw.shape[0]
    x2d = x_nchw.reshape(B, -1)                    # == torch.flatten(x, 1)
    Din = x2d.shape[1]
    Dh2 = prepared["w1c"].shape[1]
    Dh = Dh2 // 2
    D = prepared["w2b"].shape[1]
    M = prepared["p1"].shape[1]

    assert B % 8 == 0, "batch must be a multiple of 8 (f32 sublane alignment)"

    flops = (2 * B * Din * Dh2             # fused first-layer matmul
             + 2 * (2 * B * Dh * D)        # two second-layer matmuls
             + 2 * (2 * B * D * M))        # predictor matmuls
    bytes_accessed = (4 * x2d.size
                      + 2 * (prepared["w1c"].size + prepared["w2b"].size
                             + prepared["w2m"].size + prepared["p1"].size
                             + prepared["p2"].size)
                      + 4 * (prepared["g"].size + prepared["b"].size)
                      + 4 * (2 * B * D))

    q_out, k_out = pl.pallas_call(
        _fused_kernel,
        out_shape=(jax.ShapeDtypeStruct((B, D), jnp.float32),
                   jax.ShapeDtypeStruct((B, D), jnp.float32)),
        # No grid: single step, whole-array VMEM blocks, no double-buffering.
        in_specs=[_VMEM] * 8,
        out_specs=(_VMEM, _VMEM),
        compiler_params=pltpu.CompilerParams(
            vmem_limit_bytes=64 * 1024 * 1024),
        cost_estimate=pl.CostEstimate(flops=flops, transcendentals=0,
                                      bytes_accessed=bytes_accessed),
    )(x2d, prepared["w1c"], prepared["w2b"], prepared["w2m"],
      prepared["p1"], prepared["g"], prepared["b"], prepared["p2"])

    return (q_out if q else None), (k_out if k else None)


# ----------------------------- references ---------------------------------

def _bn(x, gamma=None, beta=None):
    mu = jnp.mean(x, axis=0, keepdims=True)
    c = x - mu
    var = jnp.mean(c * c, axis=0, keepdims=True)
    y = c * jax.lax.rsqrt(var + EPS)
    if gamma is not None:
        y = y * gamma + beta
    return y


def _reference_matched(x_nchw, params):
    """Same math as the kernel: bf16 dot operands, f32 accumulate, f32 BN."""
    bf = jnp.bfloat16
    x2d = x_nchw.reshape(x_nchw.shape[0], -1)

    def dot(a, wname):
        return jnp.dot(a.astype(bf), params[wname].astype(bf),
                       preferred_element_type=jnp.float32)

    h = jnp.maximum(dot(x2d, "enc_w1"), 0.0)
    f_base = dot(h, "enc_w2")
    hm = jnp.maximum(dot(x2d, "mom_w1"), 0.0)
    k_ref = dot(hm, "mom_w2")

    z1 = dot(f_base, "pred_w1")
    hr = jnp.maximum(_bn(z1, params["bn1_gamma"], params["bn1_beta"]), 0.0)
    q_ref = _bn(dot(hr, "pred_w2"))
    return q_ref, k_ref


def _reference_f32(x_nchw, params):
    x2d = x_nchw.reshape(x_nchw.shape[0], -1).astype(jnp.float32)

    def enc(x, w1, w2):
        return jnp.maximum(x @ w1, 0.0) @ w2

    f = enc(x2d, params["enc_w1"], params["enc_w2"])
    hr = jnp.maximum(_bn(f @ params["pred_w1"], params["bn1_gamma"],
                         params["bn1_beta"]), 0.0)
    q_ref = _bn(hr @ params["pred_w2"])
    k_ref = enc(x2d, params["mom_w1"], params["mom_w2"])
    return q_ref, k_ref


# --------------------------------- main ------------------------------------

if __name__ == "__main__":
    # Small shapes consistent with the forward: image input [B, C, H, W].
    B, C, H, W = 8, 4, 16, 16
    D_IN = C * H * W          # 1024 flattened features
    D_HID = 128               # encoder hidden width
    DIM = 128                 # embedding dim (module default 256, scaled down)
    MLP_DIM = 256             # predictor hidden dim (module default 4096)

    key = jax.random.PRNGKey(0)
    kx, k1, k2, k3, k4 = jax.random.split(key, 5)

    x = jax.random.normal(kx, (B, C, H, W), dtype=jnp.float32)

    enc_w1 = jax.random.normal(k1, (D_IN, D_HID), jnp.float32) * (1.0 / D_IN ** 0.5)
    enc_w2 = jax.random.normal(k2, (D_HID, DIM), jnp.float32) * (1.0 / D_HID ** 0.5)
    params = {
        "enc_w1": enc_w1,
        "enc_w2": enc_w2,
        # momentum encoder params copied from base encoder (as in __init__)
        "mom_w1": enc_w1.copy(),
        "mom_w2": enc_w2.copy(),
        # predictor = _build_mlp(2, dim, mlp_dim, dim)
        "pred_w1": jax.random.normal(k3, (DIM, MLP_DIM), jnp.float32) * (1.0 / DIM ** 0.5),
        "bn1_gamma": jnp.ones((1, MLP_DIM), jnp.float32),   # BatchNorm1d default init
        "bn1_beta": jnp.zeros((1, MLP_DIM), jnp.float32),
        "pred_w2": jax.random.normal(k4, (MLP_DIM, DIM), jnp.float32) * (1.0 / MLP_DIM ** 0.5),
    }

    # One-time, device-resident weight preparation (reused across steps).
    prepared = jax.tree_util.tree_map(jax.block_until_ready,
                                      prepare_params(params))

    q_out, k_out = contrast_momentum_forward(x, prepared, k=True, q=True)
    q_out = jax.block_until_ready(q_out)
    k_out = jax.block_until_ready(k_out)
    assert q_out.shape == (B, DIM) and k_out.shape == (B, DIM)

    # Tight check vs. a reference that uses the same bf16-operand / f32-acc math.
    q_m, k_m = _reference_matched(x, params)
    assert jnp.allclose(q_out, q_m, rtol=2e-3, atol=2e-3)
    assert jnp.allclose(k_out, k_m, rtol=2e-3, atol=2e-3)

    # Loose sanity check vs. the pure-f32 reference (bf16 rounding ~0.4%/dot).
    q_f, k_f = _reference_f32(x, params)
    assert jnp.allclose(q_out, q_f, rtol=1e-1, atol=1e-1)
    assert jnp.allclose(k_out, k_f, rtol=1e-1, atol=1e-1)

    # TODO(synk): momentum EMA update (update_momentum_encoder) is not part of
    # forward(); it is plain parameter arithmetic and is left out of the kernel.
    print("KERNEL_OK")
</pallas_src>

<mosaic_0001>
module attributes {stable_mosaic.version = 11 : i64} {
  func.func @_fused_kernel(%arg0: memref<8x1024xf32, #tpu.memory_space<vmem>>, %arg1: memref<1024x256xbf16, #tpu.memory_space<vmem>>, %arg2: memref<128x128xbf16, #tpu.memory_space<vmem>>, %arg3: memref<128x128xbf16, #tpu.memory_space<vmem>>, %arg4: memref<128x256xbf16, #tpu.memory_space<vmem>>, %arg5: memref<1x256xf32, #tpu.memory_space<vmem>>, %arg6: memref<1x256xf32, #tpu.memory_space<vmem>>, %arg7: memref<256x128xbf16, #tpu.memory_space<vmem>>, %arg8: memref<8x128xf32, #tpu.memory_space<vmem>>, %arg9: memref<8x128xf32, #tpu.memory_space<vmem>>) attributes {dimension_semantics = [], scalar_prefetch = 0 : i64, scratch_operands = 0 : i64, tpu.core_type = #tpu.core_type<tc>} {
    %c0 = arith.constant 0 : index
    %c0_0 = arith.constant 0 : index
    %0 = vector.load %arg0[%c0, %c0_0] : memref<8x1024xf32, #tpu.memory_space<vmem>>, vector<8x1024xf32>
    %1 = arith.truncf %0 : vector<8x1024xf32> to vector<8x1024xbf16>
    %c0_1 = arith.constant 0 : index
    %c0_2 = arith.constant 0 : index
    %2 = vector.load %arg1[%c0_1, %c0_2] : memref<1024x256xbf16, #tpu.memory_space<vmem>>, vector<1024x256xbf16>
    %cst = arith.constant dense<0.000000e+00> : vector<8x256xf32>
    %3 = tpu.matmul %1, %2, %cst {dimension_numbers = #tpu.dot_dimension_numbers<[1], [0], [0], [1], [0, 0, 1, 1], [], []>} : vector<8x1024xbf16>, vector<1024x256xbf16>, vector<8x256xf32> -> vector<8x256xf32>
    %cst_3 = arith.constant 0.000000e+00 : f32
    %4 = vector.broadcast %cst_3 : f32 to vector<8x256xf32>
    %5 = arith.maximumf %3, %4 : vector<8x256xf32>
    %6 = vector.extract_strided_slice %5 {offsets = [0, 0], sizes = [8, 128], strides = [1, 1]} : vector<8x256xf32> to vector<8x128xf32>
    %7 = arith.truncf %6 : vector<8x128xf32> to vector<8x128xbf16>
    %8 = vector.extract_strided_slice %5 {offsets = [0, 128], sizes = [8, 128], strides = [1, 1]} : vector<8x256xf32> to vector<8x128xf32>
    %9 = arith.truncf %8 : vector<8x128xf32> to vector<8x128xbf16>
    %c0_4 = arith.constant 0 : index
    %c0_5 = arith.constant 0 : index
    %10 = vector.load %arg2[%c0_4, %c0_5] : memref<128x128xbf16, #tpu.memory_space<vmem>>, vector<128x128xbf16>
    %cst_6 = arith.constant dense<0.000000e+00> : vector<8x128xf32>
    %11 = tpu.matmul %7, %10, %cst_6 {dimension_numbers = #tpu.dot_dimension_numbers<[1], [0], [0], [1], [0, 0, 1, 1], [], []>} : vector<8x128xbf16>, vector<128x128xbf16>, vector<8x128xf32> -> vector<8x128xf32>
    %c0_7 = arith.constant 0 : index
    %c0_8 = arith.constant 0 : index
    %12 = vector.load %arg3[%c0_7, %c0_8] : memref<128x128xbf16, #tpu.memory_space<vmem>>, vector<128x128xbf16>
    %cst_9 = arith.constant dense<0.000000e+00> : vector<8x128xf32>
    %13 = tpu.matmul %9, %12, %cst_9 {dimension_numbers = #tpu.dot_dimension_numbers<[1], [0], [0], [1], [0, 0, 1, 1], [], []>} : vector<8x128xbf16>, vector<128x128xbf16>, vector<8x128xf32> -> vector<8x128xf32>
    %c0_10 = arith.constant 0 : index
    %c0_11 = arith.constant 0 : index
    %14 = vector.load %arg9[%c0_10, %c0_11] : memref<8x128xf32, #tpu.memory_space<vmem>>, vector<8x128xf32>
    tpu.vector_store %arg9[%c0_10, %c0_11], %13 {strides = array<i32>} : memref<8x128xf32, #tpu.memory_space<vmem>>, vector<8x128xf32>,
    %15 = arith.truncf %11 : vector<8x128xf32> to vector<8x128xbf16>
    %c0_12 = arith.constant 0 : index
    %c0_13 = arith.constant 0 : index
    %16 = vector.load %arg4[%c0_12, %c0_13] : memref<128x256xbf16, #tpu.memory_space<vmem>>, vector<128x256xbf16>
    %cst_14 = arith.constant dense<0.000000e+00> : vector<8x256xf32>
    %17 = tpu.matmul %15, %16, %cst_14 {dimension_numbers = #tpu.dot_dimension_numbers<[1], [0], [0], [1], [0, 0, 1, 1], [], []>} : vector<8x128xbf16>, vector<128x256xbf16>, vector<8x256xf32> -> vector<8x256xf32>
    %cst_15 = arith.constant dense<0.000000e+00> : vector<256xf32>
    %18 = vector.multi_reduction <add>, %17, %cst_15 [0] : vector<8x256xf32> to vector<256xf32>
    %19 = vector.shape_cast %18 : vector<256xf32> to vector<1x256xf32>
    %cst_16 = arith.constant 8.000000e+00 : f32
    %20 = vector.broadcast %cst_16 : f32 to vector<1x256xf32>
    %21 = arith.divf %19, %20 : vector<1x256xf32>
    %22 = vector.broadcast %21 : vector<1x256xf32> to vector<8x256xf32>
    %23 = arith.subf %17, %22 : vector<8x256xf32>
    %24 = arith.mulf %23, %23 : vector<8x256xf32>
    %cst_17 = arith.constant dense<0.000000e+00> : vector<256xf32>
    %25 = vector.multi_reduction <add>, %24, %cst_17 [0] : vector<8x256xf32> to vector<256xf32>
    %26 = vector.shape_cast %25 : vector<256xf32> to vector<1x256xf32>
    %cst_18 = arith.constant 8.000000e+00 : f32
    %27 = vector.broadcast %cst_18 : f32 to vector<1x256xf32>
    %28 = arith.divf %26, %27 : vector<1x256xf32>
    %c0_19 = arith.constant 0 : index
    %c0_20 = arith.constant 0 : index
    %29 = vector.load %arg5[%c0_19, %c0_20] : memref<1x256xf32, #tpu.memory_space<vmem>>, vector<1x256xf32>
    %cst_21 = arith.constant 9.99999974E-6 : f32
    %30 = vector.broadcast %cst_21 : f32 to vector<1x256xf32>
    %31 = arith.addf %28, %30 : vector<1x256xf32>
    %32 = math.rsqrt %31 : vector<1x256xf32>
    %33 = arith.mulf %29, %32 : vector<1x256xf32>
    %c0_22 = arith.constant 0 : index
    %c0_23 = arith.constant 0 : index
    %34 = vector.load %arg6[%c0_22, %c0_23] : memref<1x256xf32, #tpu.memory_space<vmem>>, vector<1x256xf32>
    %35 = arith.mulf %21, %33 : vector<1x256xf32>
    %36 = arith.subf %34, %35 : vector<1x256xf32>
    %37 = vector.broadcast %33 : vector<1x256xf32> to vector<8x256xf32>
    %38 = arith.mulf %17, %37 : vector<8x256xf32>
    %39 = vector.broadcast %36 : vector<1x256xf32> to vector<8x256xf32>
    %40 = arith.addf %38, %39 : vector<8x256xf32>
    %cst_24 = arith.constant 0.000000e+00 : f32
    %41 = vector.broadcast %cst_24 : f32 to vector<8x256xf32>
    %42 = arith.maximumf %40, %41 : vector<8x256xf32>
    %43 = arith.truncf %42 : vector<8x256xf32> to vector<8x256xbf16>
    %c0_25 = arith.constant 0 : index
    %c0_26 = arith.constant 0 : index
    %44 = vector.load %arg7[%c0_25, %c0_26] : memref<256x128xbf16, #tpu.memory_space<vmem>>, vector<256x128xbf16>
    %cst_27 = arith.constant dense<0.000000e+00> : vector<8x128xf32>
    %45 = tpu.matmul %43, %44, %cst_27 {dimension_numbers = #tpu.dot_dimension_numbers<[1], [0], [0], [1], [0, 0, 1, 1], [], []>} : vector<8x256xbf16>, vector<256x128xbf16>, vector<8x128xf32> -> vector<8x128xf32>
    %cst_28 = arith.constant dense<0.000000e+00> : vector<128xf32>
    %46 = vector.multi_reduction <add>, %45, %cst_28 [0] : vector<8x128xf32> to vector<128xf32>
    %47 = vector.shape_cast %46 : vector<128xf32> to vector<1x128xf32>
    %cst_29 = arith.constant 8.000000e+00 : f32
    %48 = vector.broadcast %cst_29 : f32 to vector<1x128xf32>
    %49 = arith.divf %47, %48 : vector<1x128xf32>
    %50 = vector.broadcast %49 : vector<1x128xf32> to vector<8x128xf32>
    %51 = arith.subf %45, %50 : vector<8x128xf32>
    %52 = arith.mulf %51, %51 : vector<8x128xf32>
    %cst_30 = arith.constant dense<0.000000e+00> : vector<128xf32>
    %53 = vector.multi_reduction <add>, %52, %cst_30 [0] : vector<8x128xf32> to vector<128xf32>
    %54 = vector.shape_cast %53 : vector<128xf32> to vector<1x128xf32>
    %cst_31 = arith.constant 8.000000e+00 : f32
    %55 = vector.broadcast %cst_31 : f32 to vector<1x128xf32>
    %56 = arith.divf %54, %55 : vector<1x128xf32>
    %cst_32 = arith.constant 9.99999974E-6 : f32
    %57 = vector.broadcast %cst_32 : f32 to vector<1x128xf32>
    %58 = arith.addf %56, %57 : vector<1x128xf32>
    %59 = math.rsqrt %58 : vector<1x128xf32>
    %60 = vector.broadcast %59 : vector<1x128xf32> to vector<8x128xf32>
    %61 = arith.mulf %51, %60 : vector<8x128xf32>
    %c0_33 = arith.constant 0 : index
    %c0_34 = arith.constant 0 : index
    %62 = vector.load %arg8[%c0_33, %c0_34] : memref<8x128xf32, #tpu.memory_space<vmem>>, vector<8x128xf32>
    tpu.vector_store %arg8[%c0_33, %c0_34], %61 {strides = array<i32>} : memref<8x128xf32, #tpu.memory_space<vmem>>, vector<8x128xf32>,
    return
  }
}

</mosaic_0001>

<bundles_post_ra>
// kernel: tpu_custom_call.1
= control target key start
LH: loop header
LB: loop body
LE: loop exit
PB: predicated region body
PF: predicated region fallthrough
CT: control target
= control target key end

     0   :  { %15 = vsyncpa [#allocation3], 0  ;;  %s2761_s0 = inlined_call_operand.hbm [shape: f32[8,1024], index: 0, kind: input, shape index: {}]   ;;  %s2762_s1 = inlined_call_operand.hbm [shape: bf16[1024,256], index: 1, kind: input, shape index: {}]   ;;  %s2763_s2 = inlined_call_operand.hbm [shape: bf16[128,128], index: 2, kind: input, shape index: {}]   ;;  %s2764_s3 = inlined_call_operand.hbm [shape: bf16[128,128], index: 3, kind: input, shape index: {}]   ;;  %s2765_s4 = inlined_call_operand.hbm [shape: bf16[128,256], index: 4, kind: input, shape index: {}]   ;;  %s2766_s5 = inlined_call_operand.hbm [shape: f32[1,256], index: 5, kind: input, shape index: {}]   ;;  %s2767_s6 = inlined_call_operand.hbm [shape: f32[1,256], index: 6, kind: input, shape index: {}]   ;;  %s2768_s7 = inlined_call_operand.hbm [shape: bf16[256,128], index: 7, kind: input, shape index: {}]   ;;  %s2769_s8 = inlined_call_operand.hbm [shape: f32[8,128], index: 8, kind: output, shape index: {0}]   ;;  %s2770_s9 = inlined_call_operand.hbm [shape: f32[8,128], index: 9, kind: output, shape index: {1}]  }
   0x1   :  { %16 = vsyncpa [#allocation6], 0 }
   0x2   :  { %17 = vsyncpa [#allocation9], 0 }
   0x3   :  { %18 = vsyncpa [#allocation12], 0 }
   0x4   :  { %19 = vsyncpa [#allocation15], 0 }
   0x5   :  { %20 = vsyncpa [#allocation4], 0 }
   0x6   :  { %21 = vsyncpa [#allocation18], 0  ;;  %s2538_s30 = smov [#allocation5]   ;;  %s2304_s13 = scalar_lea.hbm %s2762_s1, 16384 }
   0x7   :  { %s37_s10 = sshll.u32 %s2538_s30, 4  ;;  %p2305_p0 = scmp.ne.s32.totalorder %s2762_s1, %s2304_s13  ;;  %s38_s10 = int_to_ptr.vmem [resolvable:$true] %s37_s10 }
   0x8   :  { %p2308_p1 = scmp.lt.u32.totalorder %s2304_s13, %s2762_s1 }
   0xa   :  { %p2310_p2 = pnand %p2308_p1, %p2305_p0 }
   0xc   :  { %2313 = shalt.err (!%p2310_p2)
}
   0xd   :  { %s2314_s18 = scalar_lea.vmem %s38_s10, 16384  ;;  %p2319_p4 = scmp.lt.s32.totalorder %s38_s10, %s38_s10 }
   0xe   :  { %p2315_p3 = scmp.ne.s32.totalorder %s38_s10, %s2314_s18  ;;  %p2320_p5 = scmp.lt.s32.totalorder %s2314_s18, %s2314_s18 }
  0x10   :  { %p2321_p6 = por %p2320_p5, %p2319_p4 }
  0x12   :  { %p2322_p7 = pnand %p2321_p6, %p2315_p3 }
  0x14   :  { %2325 = shalt.err (!%p2322_p7)
}
  0x15   :  { %s2539_s19 = smov 128   ;;  %s2540_s20 = smov 8  }
  0x16   :  { %43 = dma.hbm_to_vmem [thread:$0]  %s2762_s1, 16384, %s38_s10, [#allocation6], %s2539_s19, %s2539_s19, %s2540_s20  }
  0x17   :  { %s2541_s23 = smov [#allocation8]   ;;  %s2542_s25 = smov [#allocation11]  }
  0x18   :  { %s61_s24 = sshll.u32 %s2541_s23, 4  ;;  %s86_s26 = sshll.u32 %s2542_s25, 4  ;;  %s62_s24 = int_to_ptr.vmem [resolvable:$true] %s61_s24  ;;  %s87_s26 = int_to_ptr.vmem [resolvable:$true] %s86_s26 }
  0x19   :  { %s2326_s29 = scalar_lea.hbm %s2764_s3, 1024 }
  0x1a   :  { %p2327_p8 = scmp.ne.s32.totalorder %s2764_s3, %s2326_s29  ;;  %p2330_p9 = scmp.lt.u32.totalorder %s2326_s29, %s2764_s3 }
  0x1c   :  { %p2332_p10 = pnand %p2330_p9, %p2327_p8 }
  0x1e   :  { %2335 = shalt.err (!%p2332_p10)
}
  0x1f   :  { %s2336_s1 = scalar_lea.vmem %s62_s24, 1024  ;;  %p2341_p12 = scmp.lt.s32.totalorder %s62_s24, %s62_s24 }
  0x20   :  { %p2337_p11 = scmp.ne.s32.totalorder %s62_s24, %s2336_s1  ;;  %p2342_p13 = scmp.lt.s32.totalorder %s2336_s1, %s2336_s1 }
  0x22   :  { %p2343_p0 = por %p2342_p13, %p2341_p12 }
  0x24   :  { %p2344_p1 = pnand %p2343_p0, %p2337_p11 }
  0x26   :  { %2347 = shalt.err (!%p2344_p1)
}
  0x27   :  { %s2543_s10 = smov 64   ;;  %s2544_s14 = smov 4  }
  0x28   :  { %67 = dma.hbm_to_vmem [thread:$0]  %s2764_s3, 1024, %s62_s24, [#allocation9], %s2543_s10, %s2543_s10, %s2544_s14  }
  0x29   :  { %s2348_s21 = scalar_lea.hbm %s2766_s5, 32 }
  0x2a   :  { %p2349_p2 = scmp.ne.s32.totalorder %s2766_s5, %s2348_s21  ;;  %p2352_p3 = scmp.lt.u32.totalorder %s2348_s21, %s2766_s5 }
  0x2c   :  { %p2354_p4 = pnand %p2352_p3, %p2349_p2 }
  0x2e   :  { %2357 = shalt.err (!%p2354_p4)
}
  0x2f   :  { %s2358_s28 = scalar_lea.vmem %s87_s26, 32  ;;  %p2363_p6 = scmp.lt.s32.totalorder %s87_s26, %s87_s26 }
  0x30   :  { %p2359_p5 = scmp.ne.s32.totalorder %s87_s26, %s2358_s28  ;;  %p2364_p7 = scmp.lt.s32.totalorder %s2358_s28, %s2358_s28 }
  0x32   :  { %p2365_p8 = por %p2364_p7, %p2363_p6 }
  0x34   :  { %p2366_p9 = pnand %p2365_p8, %p2359_p5 }
  0x36   :  { %2369 = shalt.err (!%p2366_p9)
}
  0x37   :  { %89 = dma.hbm_to_vmem [thread:$0]  %s2766_s5, 32, %s87_s26, [#allocation12]  }
  0x38   :  { %s2545_s29 = smov [#allocation2]   ;;  %s2546_s11 = smov [#allocation7]  }
  0x39   :  { %s28_s30 = sshll.u32 %s2545_s29, 4  ;;  %s49_s12 = sshll.u32 %s2546_s11, 4  ;;  %s29_s30 = int_to_ptr.vmem [resolvable:$true] %s28_s30  ;;  %s50_s12 = int_to_ptr.vmem [resolvable:$true] %s49_s12 }
  0x3a   :  { %s2370_s15 = scalar_lea.hbm %s2761_s0, 1024 }
  0x3b   :  { %p2371_p10 = scmp.ne.s32.totalorder %s2761_s0, %s2370_s15  ;;  %p2374_p11 = scmp.lt.u32.totalorder %s2370_s15, %s2761_s0 }
  0x3d   :  { %p2376_p12 = pnand %p2374_p11, %p2371_p10 }
  0x3f   :  { %2379 = shalt.err (!%p2376_p12)
}
  0x40   :  { %s2380_s5 = scalar_lea.vmem %s29_s30, 1024  ;;  %p2385_p0 = scmp.lt.s32.totalorder %s29_s30, %s29_s30 }
  0x41   :  { %p2381_p13 = scmp.ne.s32.totalorder %s29_s30, %s2380_s5  ;;  %p2386_p1 = scmp.lt.s32.totalorder %s2380_s5, %s2380_s5 }
  0x43   :  { %p2387_p2 = por %p2386_p1, %p2385_p0 }
  0x45   :  { %p2388_p3 = pnand %p2387_p2, %p2381_p13 }
  0x47   :  { %2391 = shalt.err (!%p2388_p3)
}
  0x48   :  { %31 = dma.hbm_to_vmem [thread:$0]  %s2761_s0, 1024, %s29_s30, [#allocation3]  }
  0x49   :  { %s2392_s27 = scalar_lea.hbm %s2763_s2, 1024 }
  0x4a   :  { %p2393_p4 = scmp.ne.s32.totalorder %s2763_s2, %s2392_s27  ;;  %p2396_p5 = scmp.lt.u32.totalorder %s2392_s27, %s2763_s2 }
  0x4c   :  { %p2398_p6 = pnand %p2396_p5, %p2393_p4 }
  0x4e   :  { %2401 = shalt.err (!%p2398_p6)
}
  0x4f   :  { %s2402_s11 = scalar_lea.vmem %s50_s12, 1024  ;;  %p2407_p8 = scmp.lt.s32.totalorder %s50_s12, %s50_s12 }
  0x50   :  { %p2403_p7 = scmp.ne.s32.totalorder %s50_s12, %s2402_s11  ;;  %p2408_p9 = scmp.lt.s32.totalorder %s2402_s11, %s2402_s11 }
  0x52   :  { %p2409_p10 = por %p2408_p9, %p2407_p8 }
  0x54   :  { %p2410_p11 = pnand %p2409_p10, %p2403_p7 }
  0x56   :  { %2413 = shalt.err (!%p2410_p11)
}
  0x57   :  { %55 = dma.hbm_to_vmem [thread:$0]  %s2763_s2, 1024, %s50_s12, [#allocation6], %s2543_s10, %s2543_s10, %s2544_s14  }
  0x58   :  { %s2547_s13 = smov [#allocation10]   ;;  %s2548_s15 = smov [#allocation13]  }
  0x59   :  { %s73_s1 = sshll.u32 %s2547_s13, 4  ;;  %s96_s16 = sshll.u32 %s2548_s15, 4  ;;  %s74_s1 = int_to_ptr.vmem [resolvable:$true] %s73_s1  ;;  %s97_s16 = int_to_ptr.vmem [resolvable:$true] %s96_s16 }
  0x5a   :  { %s2414_s21 = scalar_lea.hbm %s2765_s4, 2048 }
  0x5b   :  { %p2415_p12 = scmp.ne.s32.totalorder %s2765_s4, %s2414_s21  ;;  %p2418_p13 = scmp.lt.u32.totalorder %s2414_s21, %s2765_s4 }
  0x5d   :  { %p2420_p0 = pnand %p2418_p13, %p2415_p12 }
  0x5f   :  { %2423 = shalt.err (!%p2420_p0)
}
  0x60   :  { %s2424_s2 = scalar_lea.vmem %s74_s1, 2048  ;;  %p2429_p2 = scmp.lt.s32.totalorder %s74_s1, %s74_s1 }
  0x61   :  { %p2425_p1 = scmp.ne.s32.totalorder %s74_s1, %s2424_s2  ;;  %p2430_p3 = scmp.lt.s32.totalorder %s2424_s2, %s2424_s2 }
  0x63   :  { %p2431_p4 = por %p2430_p3, %p2429_p2 }
  0x65   :  { %p2432_p5 = pnand %p2431_p4, %p2425_p1 }
  0x67   :  { %2435 = shalt.err (!%p2432_p5)
}
  0x68   :  { %79 = dma.hbm_to_vmem [thread:$0]  %s2765_s4, 2048, %s74_s1, [#allocation9], %s2539_s19, %s2539_s19, %s2540_s20  }
  0x69   :  { %s2436_s3 = scalar_lea.hbm %s2767_s6, 32 }
  0x6a   :  { %p2437_p6 = scmp.ne.s32.totalorder %s2767_s6, %s2436_s3  ;;  %p2440_p7 = scmp.lt.u32.totalorder %s2436_s3, %s2767_s6 }
  0x6c   :  { %p2442_p8 = pnand %p2440_p7, %p2437_p6 }
  0x6e   :  { %2445 = shalt.err (!%p2442_p8)
}
  0x6f   :  { %s2446_s30 = scalar_lea.vmem %s97_s16, 32  ;;  %p2451_p10 = scmp.lt.s32.totalorder %s97_s16, %s97_s16 }
  0x70   :  { %p2447_p9 = scmp.ne.s32.totalorder %s97_s16, %s2446_s30  ;;  %p2452_p11 = scmp.lt.s32.totalorder %s2446_s30, %s2446_s30 }
  0x72   :  { %p2453_p12 = por %p2452_p11, %p2451_p10 }
  0x74   :  { %p2454_p13 = pnand %p2453_p12, %p2447_p9 }
  0x76   :  { %2457 = shalt.err (!%p2454_p13)
}
  0x77   :  { %99 = dma.hbm_to_vmem [thread:$0]  %s2767_s6, 32, %s97_s16, [#allocation12]  }
  0x78   :  { %s2549_s20 = smov [#allocation14]   ;;  %s2458_s17 = scalar_lea.hbm %s2768_s7, 2048 }
  0x79   :  { %s105_s13 = sshll.u32 %s2549_s20, 4  ;;  %p2459_p0 = scmp.ne.s32.totalorder %s2768_s7, %s2458_s17  ;;  %s106_s13 = int_to_ptr.vmem [resolvable:$true] %s105_s13 }
  0x7a   :  { %p2462_p1 = scmp.lt.u32.totalorder %s2458_s17, %s2768_s7 }
  0x7c   :  { %p2464_p2 = pnand %p2462_p1, %p2459_p0 }
  0x7e   :  { %2467 = shalt.err (!%p2464_p2)
}
  0x7f   :  { %s2468_s22 = scalar_lea.vmem %s106_s13, 2048  ;;  %p2473_p4 = scmp.lt.s32.totalorder %s106_s13, %s106_s13 }
  0x80   :  { %p2469_p3 = scmp.ne.s32.totalorder %s106_s13, %s2468_s22  ;;  %p2474_p5 = scmp.lt.s32.totalorder %s2468_s22, %s2468_s22 }
  0x82   :  { %p2475_p6 = por %p2474_p5, %p2473_p4 }
  0x84   :  { %p2476_p7 = pnand %p2475_p6, %p2469_p3 }
  0x86   :  { %2479 = shalt.err (!%p2476_p7)
}
  0x87   :  { %111 = dma.hbm_to_vmem [thread:$0]  %s2768_s7, 2048, %s106_s13, [#allocation15], %s2543_s10, %s2543_s10, %s2544_s14  }
  0x88   :  { %2524 = dma.done.wait [#allocation3], 1024  }
  0x89   :  { %2525 = vsyncadd [#allocation3], 4294966272 }
  0x8a   :  { %2526 = dma.done.wait [#allocation6], 17408  }
  0x8b   :  { %2527 = vsyncadd [#allocation6], 4294949888 }
  0x8c   :  { %2528 = dma.done.wait [#allocation9], 3072  }
  0x8d   :  { %2529 = vsyncadd [#allocation9], 4294964224 }
  0x8e   :  { %2530 = dma.done.wait [#allocation12], 64  }
  0x8f   :  { %2531 = vsyncadd [#allocation12], 4294967232 }
  0x90   :  { %2532 = dma.done.wait [#allocation15], 2048  }
  0x91   :  { %2533 = vsyncadd [#allocation15], 4294965248  ;;  %v2050_v0 = vld [vmem:[#allocation5 + $0x104] ss:$8 sps:$4 sm:$0xff]   ;;  %v2052_v1 = vld [vmem:[#allocation5 + $0x100] ss:$8 sps:$4 sm:$0xff]  }
  0x92   :  { %962 = vmatprep.subr.bf16.mxu0 %v2050_v0  ;;  %v2053_v2 = vld [vmem:[#allocation5 + $0x114] ss:$8 sps:$4 sm:$0xff]   ;;  %v2055_v3 = vld [vmem:[#allocation5 + $0x110] ss:$8 sps:$4 sm:$0xff]   ;;  %v2056_v4 = vld [vmem:[#allocation5 + $0x124] ss:$8 sps:$4 sm:$0xff]  }
  0x93   :  { %963 = vmatpush1.bf16.msra.mxu0 %v2052_v1  ;;  %v2058_v5 = vld [vmem:[#allocation5 + $0x120] ss:$8 sps:$4 sm:$0xff]   ;;  %v2059_v6 = vld [vmem:[#allocation5 + $0x134] ss:$8 sps:$4 sm:$0xff]   ;;  %v2061_v7 = vld [vmem:[#allocation5 + $0x130] ss:$8 sps:$4 sm:$0xff]  }
  0x94   :  { %964 = vmatprep.subr.bf16.mxu0 %v2053_v2  ;;  %v2062_v8 = vld [vmem:[#allocation5 + $0x144] ss:$8 sps:$4 sm:$0xff]   ;;  %v2064_v9 = vld [vmem:[#allocation5 + $0x140] ss:$8 sps:$4 sm:$0xff]   ;;  %v2065_v10 = vld [vmem:[#allocation5 + $0x154] ss:$8 sps:$4 sm:$0xff]  }
  0x95   :  { %v2067_v11 = vld [vmem:[#allocation5 + $0x150] ss:$8 sps:$4 sm:$0xff]   ;;  %v2068_v12 = vld [vmem:[#allocation5 + $0x164] ss:$8 sps:$4 sm:$0xff]   ;;  %v2070_v15 = vld [vmem:[#allocation5 + $0x160] ss:$8 sps:$4 sm:$0xff]  }
  0x96   :  { %v140_v13 = vld [vmem:[#allocation2 + $0x18] sm:$0xff]  ;;  %v2074_v18 = vld [vmem:[#allocation5 + $0x184] ss:$8 sps:$4 sm:$0xff]   ;;  %v2076_v19 = vld [vmem:[#allocation5 + $0x180] ss:$8 sps:$4 sm:$0xff]   ;;  %vm2551_vm0 = vmmov 0  }
  0x97   :  { %965 = vmatpush1.bf16.msra.mxu0 %v2055_v3  ;;  %v148_v14 = vpack.c.bf16 %v140_v13, %v140_v13  ;;  %v2071_v16 = vld [vmem:[#allocation5 + $0x174] ss:$8 sps:$4 sm:$0xff]   ;;  %v2073_v17 = vld [vmem:[#allocation5 + $0x170] ss:$8 sps:$4 sm:$0xff]   ;;  %v2080_v22 = vld [vmem:[#allocation5 + $0x1a4] ss:$8 sps:$4 sm:$0xff]  }
  0x98   :  { %966 = vmatprep.subr.bf16.mxu0 %v2056_v4  ;;  %v2077_v20 = vld [vmem:[#allocation5 + $0x194] ss:$8 sps:$4 sm:$0xff]   ;;  %v2079_v21 = vld [vmem:[#allocation5 + $0x190] ss:$8 sps:$4 sm:$0xff]   ;;  %v2082_v23 = vld [vmem:[#allocation5 + $0x1a0] ss:$8 sps:$4 sm:$0xff]  }
  0x99   :  { %994 = vmatprep.mubr.bf16.mxu0 %v148_v14  ;;  %v2083_v24 = vld [vmem:[#allocation5 + $0x1b4] ss:$8 sps:$4 sm:$0xff]   ;;  %v2085_v25 = vld [vmem:[#allocation5 + $0x1b0] ss:$8 sps:$4 sm:$0xff]   ;;  %v2086_v26 = vld [vmem:[#allocation5 + $0x1c4] ss:$8 sps:$4 sm:$0xff]  }
  0x9a   :  { %v2146_v27 = vld [vmem:[#allocation5 + $0x4] ss:$8 sps:$4 sm:$0xff]   ;;  %v2148_v28 = vld [vmem:[#allocation5] ss:$8 sps:$4 sm:$0xff]   ;;  %v2152_v30 = vld [vmem:[#allocation5 + $0x14] ss:$8 sps:$4 sm:$0xff]  }
  0x9b   :  { %967 = vmatpush1.bf16.msra.mxu0 %v2058_v5  ;;  %921 = vmatprep.subr.bf16.mxu1 %v2146_v27  ;;  %v2088_v29 = vld [vmem:[#allocation5 + $0x1c0] ss:$8 sps:$4 sm:$0xff]   ;;  %v2154_v31 = vld [vmem:[#allocation5 + $0x10] ss:$8 sps:$4 sm:$0xff]   ;;  %v2089_v32 = vld [vmem:[#allocation5 + $0x1d4] ss:$8 sps:$4 sm:$0xff]  }
  0x9c   :  { %968 = vmatprep.subr.bf16.mxu0 %v2059_v6  ;;  %922 = vmatpush1.bf16.msra.mxu1 %v2148_v28  ;;  %v2091_v33 = vld [vmem:[#allocation5 + $0x1d0] ss:$8 sps:$4 sm:$0xff]   ;;  %v2158_v34 = vld [vmem:[#allocation5 + $0x24] ss:$8 sps:$4 sm:$0xff]   ;;  %v2160_v36 = vld [vmem:[#allocation5 + $0x20] ss:$8 sps:$4 sm:$0xff]  }
  0x9d   :  { %923 = vmatprep.subr.bf16.mxu1 %v2152_v30  ;;  %v2092_v35 = vld [vmem:[#allocation5 + $0x1e4] ss:$8 sps:$4 sm:$0xff]   ;;  %v2164_v37 = vld [vmem:[#allocation5 + $0x34] ss:$8 sps:$4 sm:$0xff]   ;;  %v2094_v38 = vld [vmem:[#allocation5 + $0x1e0] ss:$8 sps:$4 sm:$0xff]  }
  0x9e   :  { %v2095_v39 = vld [vmem:[#allocation5 + $0x1f4] ss:$8 sps:$4 sm:$0xff]   ;;  %v2166_v40 = vld [vmem:[#allocation5 + $0x30] ss:$8 sps:$4 sm:$0xff]   ;;  %v2170_v41 = vld [vmem:[#allocation5 + $0x44] ss:$8 sps:$4 sm:$0xff]  }
  0x9f   :  { %969 = vmatpush1.bf16.msra.mxu0 %v2061_v7  ;;  %v2097_v42 = vld [vmem:[#allocation5 + $0x1f0] ss:$8 sps:$4 sm:$0xff]   ;;  %v2100_v43 = vld [vmem:[#allocation5 + $0x204] ss:$8 sps:$4 sm:$0xff]   ;;  %v2172_v46 = vld [vmem:[#allocation5 + $0x40] ss:$8 sps:$4 sm:$0xff]  }
  0xa0   :  { %970 = vmatprep.subr.bf16.mxu0 %v2062_v8  ;;  %924 = vmatpush1.bf16.msra.mxu1 %v2154_v31  ;;  %v139_v44 = vld [vmem:[#allocation2 + $0x10] sm:$0xff]  ;;  %v142_v45 = vld [vmem:[#allocation2 + $0x28] sm:$0xff]  ;;  %v137_v31 = vld [vmem:[#allocation2] sm:$0xff]  ;;  %s2554_s7 = smov [#allocation17]  }
  0xa1   :  { %925 = vmatprep.subr.bf16.mxu1 %v2158_v34  ;;  %v2176_v47 = vld [vmem:[#allocation5 + $0x54] ss:$8 sps:$4 sm:$0xff]   ;;  %v147_v48 = vpack.c.bf16 %v139_v44, %v139_v44  ;;  %v2098_v49 = vld [vmem:[#allocation5 + $0x200] ss:$8 sps:$4 sm:$0xff]   ;;  %v150_v51 = vpack.c.bf16 %v142_v45, %v142_v45  ;;  %v2178_v52 = vld [vmem:[#allocation5 + $0x50] ss:$8 sps:$4 sm:$0xff]  }
  0xa2   :  { %v2103_v50 = vld [vmem:[#allocation5 + $0x214] ss:$8 sps:$4 sm:$0xff]   ;;  %v2182_v53 = vld [vmem:[#allocation5 + $0x64] ss:$8 sps:$4 sm:$0xff]   ;;  %v2101_v54 = vld [vmem:[#allocation5 + $0x210] ss:$8 sps:$4 sm:$0xff]  }
  0xa3   :  { %971 = vmatpush1.bf16.msra.mxu0 %v2064_v9  ;;  %v2106_v55 = vld [vmem:[#allocation5 + $0x224] ss:$8 sps:$4 sm:$0xff]   ;;  %v2184_v56 = vld [vmem:[#allocation5 + $0x60] ss:$8 sps:$4 sm:$0xff]   ;;  %v2188_v57 = vld [vmem:[#allocation5 + $0x74] ss:$8 sps:$4 sm:$0xff]  }
  0xa4   :  { %972 = vmatprep.subr.bf16.mxu0 %v2065_v10  ;;  %926 = vmatpush1.bf16.msra.mxu1 %v2160_v36  ;;  %v2104_v58 = vld [vmem:[#allocation5 + $0x220] ss:$8 sps:$4 sm:$0xff]   ;;  %v2109_v59 = vld [vmem:[#allocation5 + $0x234] ss:$8 sps:$4 sm:$0xff]   ;;  %v2190_v60 = vld [vmem:[#allocation5 + $0x70] ss:$8 sps:$4 sm:$0xff]  }
  0xa5   :  { %927 = vmatprep.subr.bf16.mxu1 %v2164_v37  ;;  %v2194_v61 = vld [vmem:[#allocation5 + $0x84] ss:$8 sps:$4 sm:$0xff]   ;;  %v2107_v62 = vld [vmem:[#allocation5 + $0x230] ss:$8 sps:$4 sm:$0xff]   ;;  %v2196_v0 = vld [vmem:[#allocation5 + $0x80] ss:$8 sps:$4 sm:$0xff]  }
  0xa6   :  { %v2112_v63 = vld [vmem:[#allocation5 + $0x244] ss:$8 sps:$4 sm:$0xff]   ;;  %v2200_v1 = vld [vmem:[#allocation5 + $0x94] ss:$8 sps:$4 sm:$0xff]   ;;  %v2110_v2 = vld [vmem:[#allocation5 + $0x240] ss:$8 sps:$4 sm:$0xff]  }
  0xa7   :  { %973 = vmatpush1.bf16.msra.mxu0 %v2067_v11  ;;  %v2115_v3 = vld [vmem:[#allocation5 + $0x254] ss:$8 sps:$4 sm:$0xff]   ;;  %v2202_v4 = vld [vmem:[#allocation5 + $0x90] ss:$8 sps:$4 sm:$0xff]   ;;  %v2206_v5 = vld [vmem:[#allocation5 + $0xa4] ss:$8 sps:$4 sm:$0xff]  }
  0xa8   :  { %974 = vmatprep.subr.bf16.mxu0 %v2068_v12  ;;  %928 = vmatpush1.bf16.msra.mxu1 %v2166_v40  ;;  %v2113_v6 = vld [vmem:[#allocation5 + $0x250] ss:$8 sps:$4 sm:$0xff]   ;;  %v2118_v7 = vld [vmem:[#allocation5 + $0x264] ss:$8 sps:$4 sm:$0xff]   ;;  %v2208_v8 = vld [vmem:[#allocation5 + $0xa0] ss:$8 sps:$4 sm:$0xff]  }
  0xa9   :  { %929 = vmatprep.subr.bf16.mxu1 %v2170_v41  ;;  %v2212_v9 = vld [vmem:[#allocation5 + $0xb4] ss:$8 sps:$4 sm:$0xff]   ;;  %v138_v10 = vld [vmem:[#allocation2 + $0x8] sm:$0xff]  ;;  %v2214_v14 = vld [vmem:[#allocation5 + $0xb0] ss:$8 sps:$4 sm:$0xff]   ;;  %v2550_v37 = vmov 0.0  }
  0xaa   :  { %v146_v11 = vpack.c.bf16 %v138_v10, %v138_v10  ;;  %v2116_v12 = vld [vmem:[#allocation5 + $0x260] ss:$8 sps:$4 sm:$0xff]   ;;  %v2121_v13 = vld [vmem:[#allocation5 + $0x274] ss:$8 sps:$4 sm:$0xff]   ;;  %v2238_v30 = vld [vmem:[#allocation5 + $0xf0] ss:$8 sps:$4 sm:$0xff]  }
  0xab   :  { %975 = vmatpush1.bf16.msra.mxu0 %v2070_v15  ;;  %v2218_v15 = vld [vmem:[#allocation5 + $0xc4] ss:$8 sps:$4 sm:$0xff]   ;;  %v2236_v27 = vld [vmem:[#allocation5 + $0xf4] ss:$8 sps:$4 sm:$0xff]   ;;  %v2128_v28 = vld [vmem:[#allocation5 + $0x2a0] ss:$8 sps:$4 sm:$0xff]  }
  0xac   :  { %976 = vmatprep.subr.bf16.mxu0 %v2071_v16  ;;  %930 = vmatpush1.bf16.msra.mxu1 %v2172_v46  ;;  %v2119_v16 = vld [vmem:[#allocation5 + $0x270] ss:$8 sps:$4 sm:$0xff]   ;;  %v2242_v34 = vld [vmem:[#allocation7] sm:$0xff]   ;;  %v2145_v44 = vld [vmem:[#allocation5 + $0x2f4] ss:$8 sps:$4 sm:$0xff]   ;;  %s1749_s10 = sshll.u32 %s2554_s7, 4  ;;  %s1750_s10 = int_to_ptr.vmem [resolvable:$true] %s1749_s10 }
  0xad   :  { %931 = vmatprep.subr.bf16.mxu1 %v2176_v47  ;;  %953 = vmatprep.mubr.bf16.mxu1 %v146_v11  ;;  %v2134_v36 = vld [vmem:[#allocation5 + $0x2c0] ss:$8 sps:$4 sm:$0xff]   ;;  %v2137_v40 = vld [vmem:[#allocation5 + $0x2d0] ss:$8 sps:$4 sm:$0xff]   ;;  %v2142_v41 = vld [vmem:[#allocation5 + $0x2e4] ss:$8 sps:$4 sm:$0xff]   ;;  %p2485_p9 = scmp.lt.s32.totalorder %s1750_s10, %s1750_s10 }
  0xae   :  { %v2245_v45 = vld [vmem:[#allocation7 + $0x18] sm:$0xff]   ;;  %v141_v47 = vld [vmem:[#allocation2 + $0x20] sm:$0xff]  ;;  %s2480_s14 = scalar_lea.vmem %s1750_s10, 128 }
  0xaf   :  { %977 = vmatpush1.bf16.msra.mxu0 %v2073_v17  ;;  %v2124_v17 = vld [vmem:[#allocation5 + $0x284] ss:$8 sps:$4 sm:$0xff]   ;;  %v2143_v46 = vld [vmem:[#allocation5 + $0x2f0] ss:$8 sps:$4 sm:$0xff]   ;;  %v2209_v10 = vld [vmem:[#allocation5 + $0x3a0] ss:$8 sps:$4 sm:$0xff]   ;;  %p2481_p8 = scmp.ne.s32.totalorder %s1750_s10, %s2480_s14  ;;  %p2486_p10 = scmp.lt.s32.totalorder %s2480_s14, %s2480_s14 }
  0xb0   :  { %978 = vmatprep.subr.bf16.mxu0 %v2074_v18  ;;  %932 = vmatpush1.bf16.msra.mxu1 %v2178_v52  ;;  %v2220_v18 = vld [vmem:[#allocation5 + $0xc0] ss:$8 sps:$4 sm:$0xff]   ;;  %v2217_v11 = vld [vmem:[#allocation5 + $0x3b4] ss:$8 sps:$4 sm:$0xff]  }
  0xb1   :  { %933 = vmatprep.subr.bf16.mxu1 %v2182_v53  ;;  %v2149_v52 = vld [vmem:[#allocation5 + $0x300] ss:$8 sps:$4 sm:$0xff]   ;;  %p2487_p11 = por %p2486_p10, %p2485_p9 }
  0xb3   :  { %979 = vmatpush1.bf16.msra.mxu0 %v2076_v19  ;;  %v2122_v19 = vld [vmem:[#allocation5 + $0x280] ss:$8 sps:$4 sm:$0xff]   ;;  %p2488_p12 = pnand %p2487_p11, %p2481_p8 }
  0xb4   :  { %980 = vmatprep.subr.bf16.mxu0 %v2077_v20  ;;  %934 = vmatpush1.bf16.msra.mxu1 %v2184_v56  ;;  %v2224_v20 = vld [vmem:[#allocation5 + $0xd4] ss:$8 sps:$4 sm:$0xff]   ;;  %v2155_v56 = vld [vmem:[#allocation5 + $0x310] ss:$8 sps:$4 sm:$0xff]  }
  0xb5   :  { %935 = vmatprep.subr.bf16.mxu1 %v2188_v57  ;;  %v2163_v57 = vld [vmem:[#allocation5 + $0x324] ss:$8 sps:$4 sm:$0xff]  }
  0xb7   :  { %981 = vmatpush1.bf16.msra.mxu0 %v2079_v21  ;;  %v2127_v21 = vld [vmem:[#allocation5 + $0x294] ss:$8 sps:$4 sm:$0xff]  }
  0xb8   :  { %982 = vmatprep.subr.bf16.mxu0 %v2080_v22  ;;  %936 = vmatpush1.bf16.msra.mxu1 %v2190_v60  ;;  %v2226_v22 = vld [vmem:[#allocation5 + $0xd0] ss:$8 sps:$4 sm:$0xff]  }
  0xb9   :  { %937 = vmatprep.subr.bf16.mxu1 %v2194_v61  ;;  %v2167_v60 = vld [vmem:[#allocation5 + $0x330] ss:$8 sps:$4 sm:$0xff]   ;;  %v2175_v61 = vld [vmem:[#allocation5 + $0x344] ss:$8 sps:$4 sm:$0xff]  }
  0xbb   :  { %983 = vmatpush1.bf16.msra.mxu0 %v2082_v23  ;;  %v2230_v23 = vld [vmem:[#allocation5 + $0xe4] ss:$8 sps:$4 sm:$0xff]  }
  0xbc   :  { %984 = vmatprep.subr.bf16.mxu0 %v2083_v24  ;;  %938 = vmatpush1.bf16.msra.mxu1 %v2196_v0  ;;  %v2125_v24 = vld [vmem:[#allocation5 + $0x290] ss:$8 sps:$4 sm:$0xff]  }
  0xbd   :  { %939 = vmatprep.subr.bf16.mxu1 %v2200_v1  ;;  %v2179_v0 = vld [vmem:[#allocation5 + $0x350] ss:$8 sps:$4 sm:$0xff]   ;;  %v2187_v1 = vld [vmem:[#allocation5 + $0x364] ss:$8 sps:$4 sm:$0xff]  }
  0xbf   :  { %985 = vmatpush1.bf16.msra.mxu0 %v2085_v25  ;;  %v2130_v25 = vld [vmem:[#allocation5 + $0x2a4] ss:$8 sps:$4 sm:$0xff]  }
  0xc0   :  { %986 = vmatprep.subr.bf16.mxu0 %v2086_v26  ;;  %940 = vmatpush1.bf16.msra.mxu1 %v2202_v4  ;;  %v2232_v26 = vld [vmem:[#allocation5 + $0xe0] ss:$8 sps:$4 sm:$0xff]   ;;  %v2191_v4 = vld [vmem:[#allocation5 + $0x370] ss:$8 sps:$4 sm:$0xff]  }
  0xc1   :  { %941 = vmatprep.subr.bf16.mxu1 %v2206_v5  ;;  %v2199_v5 = vld [vmem:[#allocation5 + $0x384] ss:$8 sps:$4 sm:$0xff]  }
  0xc3   :  { %987 = vmatpush1.bf16.msra.mxu0 %v2088_v29  ;;  %v2133_v29 = vld [vmem:[#allocation5 + $0x2b4] ss:$8 sps:$4 sm:$0xff]  }
  0xc4   :  { %988 = vmatprep.subr.bf16.mxu0 %v2089_v32  ;;  %942 = vmatpush1.bf16.msra.mxu1 %v2208_v8  ;;  %v2131_v32 = vld [vmem:[#allocation5 + $0x2b0] ss:$8 sps:$4 sm:$0xff]  }
  0xc5   :  { %943 = vmatprep.subr.bf16.mxu1 %v2212_v9  ;;  %v2203_v8 = vld [vmem:[#allocation5 + $0x390] ss:$8 sps:$4 sm:$0xff]   ;;  %v2211_v9 = vld [vmem:[#allocation5 + $0x3a4] ss:$8 sps:$4 sm:$0xff]  }
  0xc7   :  { %989 = vmatpush1.bf16.msra.mxu0 %v2091_v33  ;;  %v2136_v33 = vld [vmem:[#allocation5 + $0x2c4] ss:$8 sps:$4 sm:$0xff]  }
  0xc8   :  { %990 = vmatprep.subr.bf16.mxu0 %v2092_v35  ;;  %944 = vmatpush1.bf16.msra.mxu1 %v2214_v14  ;;  %v145_v35 = vpack.c.bf16 %v137_v31, %v137_v31  ;;  %v2221_v14 = vld [vmem:[#allocation5 + $0x3c0] ss:$8 sps:$4 sm:$0xff]  }
  0xc9   :  { %945 = vmatprep.subr.bf16.mxu1 %v2218_v15  ;;  %v2229_v15 = vld [vmem:[#allocation5 + $0x3d4] ss:$8 sps:$4 sm:$0xff]  }
  0xcb   :  { %991 = vmatpush1.bf16.msra.mxu0 %v2094_v38  ;;  %v2139_v38 = vld [vmem:[#allocation5 + $0x2d4] ss:$8 sps:$4 sm:$0xff]  }
  0xcc   :  { %992 = vmatprep.subr.bf16.mxu0 %v2095_v39  ;;  %946 = vmatpush1.bf16.msra.mxu1 %v2220_v18  ;;  %v2243_v39 = vld [vmem:[#allocation7 + $0x8] sm:$0xff]  }
  0xcd   :  { %947 = vmatprep.subr.bf16.mxu1 %v2224_v20  ;;  %v2233_v18 = vld [vmem:[#allocation5 + $0x3e0] ss:$8 sps:$4 sm:$0xff]   ;;  %v2239_v20 = vld [vmem:[#allocation5 + $0x3f0] ss:$8 sps:$4 sm:$0xff]  }
  0xcf   :  { %993 = vmatpush1.bf16.msra.mxu0 %v2097_v42  ;;  %v2244_v42 = vld [vmem:[#allocation7 + $0x10] sm:$0xff]  }
  0xd0   :  { %1003 = vmatprep.subr.bf16.mxu0 %v2100_v43  ;;  %948 = vmatpush1.bf16.msra.mxu1 %v2226_v22  ;;  %v2140_v43 = vld [vmem:[#allocation5 + $0x2e0] ss:$8 sps:$4 sm:$0xff]  }
  0xd1   :  { %949 = vmatprep.subr.bf16.mxu1 %v2230_v23  ;;  %v2248_v23 = vld [vmem:[#allocation7 + $0x30] sm:$0xff]  }
  0xd2   :  { %995 = vmatmul.mubr.bf16.vlgmr.msra.gmra.mrb[0].mxu0 %v147_v48  ;;  %v2151_v48 = vld [vmem:[#allocation5 + $0x304] ss:$8 sps:$4 sm:$0xff]  }
  0xd3   :  { %1004 = vmatpush1.bf16.msra.mxu0 %v2098_v49  ;;  %1035 = vmatprep.mubr.bf16.mxu0 %v150_v51  ;;  %v144_v49 = vld [vmem:[#allocation2 + $0x38] sm:$0xff]  ;;  %v149_v51 = vpack.c.bf16 %v141_v47, %v141_v47  ;;  %v2260_v47 = vld [vmem:[#allocation10 + $0x4] ss:$8 sps:$4 sm:$0xff]  }
  0xd4   :  { %1005 = vmatprep.subr.bf16.mxu0 %v2103_v50  ;;  %950 = vmatpush1.bf16.msra.mxu1 %v2232_v26  ;;  %v2246_v50 = vld [vmem:[#allocation7 + $0x20] sm:$0xff]   ;;  %v152_v53 = vpack.c.bf16 %v144_v49, %v144_v49 }
  0xd5   :  { %951 = vmatprep.subr.bf16.mxu1 %v2236_v27 }
  0xd7   :  { %1006 = vmatpush1.bf16.msra.mxu0 %v2101_v54  ;;  %v2157_v54 = vld [vmem:[#allocation5 + $0x314] ss:$8 sps:$4 sm:$0xff]  }
  0xd8   :  { %1007 = vmatprep.subr.bf16.mxu0 %v2106_v55  ;;  %952 = vmatpush1.bf16.msra.mxu1 %v2238_v30  ;;  %v2247_v55 = vld [vmem:[#allocation7 + $0x28] sm:$0xff]  }
  0xd9   :  { %1982 = vmatprep.subr.bf16.mxu1 %v2550_v37 }
  0xdb   :  { %1008 = vmatpush1.bf16.msra.mxu0 %v2104_v58  ;;  %954 = vmatmul.mubr.bf16.vlgmr.msra.gmra.mrb[0].mxu1 %v145_v35  ;;  %v2161_v58 = vld [vmem:[#allocation5 + $0x320] ss:$8 sps:$4 sm:$0xff]  }
  0xdc   :  { %1009 = vmatprep.subr.bf16.mxu0 %v2109_v59  ;;  %1983 = vmatpush3.bf16.msra.mxu1 %v2242_v34  ;;  %v2169_v59 = vld [vmem:[#allocation5 + $0x334] ss:$8 sps:$4 sm:$0xff]  }
  0xdd   :  { %1984 = vmatprep.subr.bf16.mxu1 %v2550_v37  ;;  %1998 = vmatprep.mubr.msk.bf16.mxu1 %vm2551_vm0, %v2550_v37 }
  0xdf   :  { %1010 = vmatpush1.bf16.msra.mxu0 %v2107_v62  ;;  %v2173_v62 = vld [vmem:[#allocation5 + $0x340] ss:$8 sps:$4 sm:$0xff]  }
  0xe0   :  { %1011 = vmatprep.subr.bf16.mxu0 %v2112_v63  ;;  %1985 = vmatpush3.bf16.msra.mxu1 %v2243_v39  ;;  %v2181_v63 = vld [vmem:[#allocation5 + $0x354] ss:$8 sps:$4 sm:$0xff]   ;;  %v2251_v39 = vld [vmem:[#allocation8 + $0x8] sm:$0xff]  }
  0xe1   :  { %1986 = vmatprep.subr.bf16.mxu1 %v2550_v37 }
  0xe3   :  { %1012 = vmatpush1.bf16.msra.mxu0 %v2110_v2  ;;  %v2185_v2 = vld [vmem:[#allocation5 + $0x360] ss:$8 sps:$4 sm:$0xff]  }
  0xe4   :  { %1013 = vmatprep.subr.bf16.mxu0 %v2115_v3  ;;  %1987 = vmatpush3.bf16.msra.mxu1 %v2244_v42  ;;  %v2193_v3 = vld [vmem:[#allocation5 + $0x374] ss:$8 sps:$4 sm:$0xff]   ;;  %v2254_v42 = vld [vmem:[#allocation8 + $0x20] sm:$0xff]  }
  0xe5   :  { %1988 = vmatprep.subr.bf16.mxu1 %v2550_v37 }
  0xe7   :  { %1014 = vmatpush1.bf16.msra.mxu0 %v2113_v6  ;;  %v2197_v6 = vld [vmem:[#allocation5 + $0x380] ss:$8 sps:$4 sm:$0xff]  }
  0xe8   :  { %1015 = vmatprep.subr.bf16.mxu0 %v2118_v7  ;;  %1989 = vmatpush3.bf16.msra.mxu1 %v2245_v45  ;;  %v2205_v7 = vld [vmem:[#allocation5 + $0x394] ss:$8 sps:$4 sm:$0xff]  }
  0xe9   :  { %1990 = vmatprep.subr.bf16.mxu1 %v2550_v37  ;;  %v2257_v45 = vld [vmem:[#allocation8 + $0x38] sm:$0xff]  }
  0xeb   :  { %1016 = vmatpush1.bf16.msra.mxu0 %v2116_v12  ;;  %v2215_v12 = vld [vmem:[#allocation5 + $0x3b0] ss:$8 sps:$4 sm:$0xff]  }
  0xec   :  { %1017 = vmatprep.subr.bf16.mxu0 %v2121_v13  ;;  %1991 = vmatpush3.bf16.msra.mxu1 %v2246_v50  ;;  %v2223_v13 = vld [vmem:[#allocation5 + $0x3c4] ss:$8 sps:$4 sm:$0xff]   ;;  %v2263_v50 = vld [vmem:[#allocation10 + $0x14] ss:$8 sps:$4 sm:$0xff]  }
  0xed   :  { %1992 = vmatprep.subr.bf16.mxu1 %v2550_v37 }
  0xef   :  { %1018 = vmatpush1.bf16.msra.mxu0 %v2119_v16  ;;  %v2227_v16 = vld [vmem:[#allocation5 + $0x3d0] ss:$8 sps:$4 sm:$0xff]  }
  0xf0   :  { %1019 = vmatprep.subr.bf16.mxu0 %v2124_v17  ;;  %1993 = vmatpush3.bf16.msra.mxu1 %v2247_v55  ;;  %v2235_v17 = vld [vmem:[#allocation5 + $0x3e4] ss:$8 sps:$4 sm:$0xff]   ;;  %v2267_v55 = vld [vmem:[#allocation10 + $0x30] ss:$8 sps:$4 sm:$0xff]  }
  0xf1   :  { %1994 = vmatprep.subr.bf16.mxu1 %v2550_v37 }
  0xf3   :  { %1020 = vmatpush1.bf16.msra.mxu0 %v2122_v19  ;;  %v2241_v19 = vld [vmem:[#allocation5 + $0x3f4] ss:$8 sps:$4 sm:$0xff]  }
  0xf4   :  { %1021 = vmatprep.subr.bf16.mxu0 %v2127_v21  ;;  %v143_v21 = vld [vmem:[#allocation2 + $0x30] sm:$0xff]  ;;  %1995 = vmatpush3.bf16.msra.mxu1 %v2248_v23  ;;  %v2296_v23 = vld [vmem:[#allocation14 + $0x78] sm:$0xff]  }
  0xf5   :  { %v151_v22 = vpack.c.bf16 %v143_v21, %v143_v21  ;;  %1996 = vmatprep.subr.bf16.mxu1 %v2550_v37  ;;  %v2294_v21 = vld [vmem:[#allocation14 + $0x70] sm:$0xff]  }
  0xf7   :  { %1022 = vmatpush1.bf16.msra.mxu0 %v2125_v24  ;;  %v2249_v24 = vld [vmem:[#allocation7 + $0x38] sm:$0xff]  }
  0xf8   :  { %1023 = vmatprep.subr.bf16.mxu0 %v2130_v25  ;;  %1997 = vmatpush3.bf16.msra.mxu1 %v2249_v24  ;;  %v2297_v24 = vld [vmem:[#allocation14 + $0x38] sm:$0xff]  }
  0xf9   :  { %2002 = vmatprep.subr.bf16.mxu1 %v2550_v37 }
  0xfb   :  { %1024 = vmatpush1.bf16.msra.mxu0 %v2128_v28 }
  0xfc   :  { %1025 = vmatprep.subr.bf16.mxu0 %v2133_v29 }
  0xff   :  { %1026 = vmatpush1.bf16.msra.mxu0 %v2131_v32 }
 0x100   :  { %1027 = vmatprep.subr.bf16.mxu0 %v2136_v33 }
 0x103   :  { %1028 = vmatpush1.bf16.msra.mxu0 %v2134_v36  ;;  %v2250_v36 = vld [vmem:[#allocation8] sm:$0xff]  }
 0x104   :  { %1029 = vmatprep.subr.bf16.mxu0 %v2139_v38 }
 0x107   :  { %1030 = vmatpush1.bf16.msra.mxu0 %v2137_v40  ;;  %v2252_v40 = vld [vmem:[#allocation8 + $0x10] sm:$0xff]  }
 0x108   :  { %1031 = vmatprep.subr.bf16.mxu0 %v2142_v41  ;;  %v2253_v41 = vld [vmem:[#allocation8 + $0x18] sm:$0xff]  }
 0x10b   :  { %1032 = vmatpush1.bf16.msra.mxu0 %v2140_v43  ;;  %v2255_v43 = vld [vmem:[#allocation8 + $0x28] sm:$0xff]  }
 0x10c   :  { %1033 = vmatprep.subr.bf16.mxu0 %v2145_v44  ;;  %v2256_v44 = vld [vmem:[#allocation8 + $0x30] sm:$0xff]  }
 0x10f   :  { %1034 = vmatpush1.bf16.msra.mxu0 %v2143_v46 }
 0x110   :  { %1044 = vmatprep.subr.bf16.mxu0 %v2151_v48  ;;  %v2258_v48 = vld [vmem:[#allocation10] ss:$8 sps:$4 sm:$0xff]  }
 0x112   :  { %1036 = vmatmul.mubr.bf16.vlgmr.msra.gmra.mrb[0].mxu0 %v149_v51  ;;  %v2261_v51 = vld [vmem:[#allocation10 + $0x10] ss:$8 sps:$4 sm:$0xff]  }
 0x113   :  { %1045 = vmatpush1.bf16.msra.mxu0 %v2149_v52  ;;  %1076 = vmatprep.mubr.bf16.mxu0 %v152_v53  ;;  %v2266_v52 = vld [vmem:[#allocation10 + $0x24] ss:$8 sps:$4 sm:$0xff]   ;;  %v2264_v53 = vld [vmem:[#allocation10 + $0x20] ss:$8 sps:$4 sm:$0xff]  }
 0x114   :  { %1046 = vmatprep.subr.bf16.mxu0 %v2157_v54  ;;  %v2269_v54 = vld [vmem:[#allocation10 + $0x34] ss:$8 sps:$4 sm:$0xff]  }
 0x117   :  { %1047 = vmatpush1.bf16.msra.mxu0 %v2155_v56  ;;  %v2272_v56 = vld [vmem:[#allocation10 + $0x44] ss:$8 sps:$4 sm:$0xff]  }
 0x118   :  { %1048 = vmatprep.subr.bf16.mxu0 %v2163_v57  ;;  %v2275_v57 = vld [vmem:[#allocation10 + $0x54] ss:$8 sps:$4 sm:$0xff]  }
 0x11b   :  { %1049 = vmatpush1.bf16.msra.mxu0 %v2161_v58  ;;  %v2273_v58 = vld [vmem:[#allocation10 + $0x50] ss:$8 sps:$4 sm:$0xff]  }
 0x11c   :  { %1050 = vmatprep.subr.bf16.mxu0 %v2169_v59  ;;  %v2278_v59 = vld [vmem:[#allocation10 + $0x64] ss:$8 sps:$4 sm:$0xff]  }
 0x11f   :  { %1051 = vmatpush1.bf16.msra.mxu0 %v2167_v60  ;;  %v2276_v60 = vld [vmem:[#allocation10 + $0x60] ss:$8 sps:$4 sm:$0xff]  }
 0x120   :  { %1052 = vmatprep.subr.bf16.mxu0 %v2175_v61  ;;  %v2281_v61 = vld [vmem:[#allocation10 + $0x74] ss:$8 sps:$4 sm:$0xff]  }
 0x123   :  { %1053 = vmatpush1.bf16.msra.mxu0 %v2173_v62  ;;  %v2279_v62 = vld [vmem:[#allocation10 + $0x70] ss:$8 sps:$4 sm:$0xff]  }
 0x124   :  { %1054 = vmatprep.subr.bf16.mxu0 %v2181_v63  ;;  %v2552_v63 = vmov 0  }
 0x127   :  { %1055 = vmatpush1.bf16.msra.mxu0 %v2179_v0 }
 0x128   :  { %1056 = vmatprep.subr.bf16.mxu0 %v2187_v1 }
 0x12b   :  { %1057 = vmatpush1.bf16.msra.mxu0 %v2185_v2 }
 0x12c   :  { %1058 = vmatprep.subr.bf16.mxu0 %v2193_v3 }
 0x12f   :  { %1059 = vmatpush1.bf16.msra.mxu0 %v2191_v4 }
 0x130   :  { %1060 = vmatprep.subr.bf16.mxu0 %v2199_v5 }
 0x133   :  { %1061 = vmatpush1.bf16.msra.mxu0 %v2197_v6 }
 0x134   :  { %1062 = vmatprep.subr.bf16.mxu0 %v2205_v7 }
 0x137   :  { %1063 = vmatpush1.bf16.msra.mxu0 %v2203_v8 }
 0x138   :  { %1064 = vmatprep.subr.bf16.mxu0 %v2211_v9  ;;  %v2282_v9 = vld [vmem:[#allocation14 + $0x40] sm:$0xff]  }
 0x13b   :  { %1065 = vmatpush1.bf16.msra.mxu0 %v2209_v10  ;;  %v2283_v10 = vld [vmem:[#allocation14] sm:$0xff]  }
 0x13c   :  { %1066 = vmatprep.subr.bf16.mxu0 %v2217_v11  ;;  %v2284_v11 = vld [vmem:[#allocation14 + $0x48] sm:$0xff]  }
 0x13f   :  { %1067 = vmatpush1.bf16.msra.mxu0 %v2215_v12  ;;  %v2285_v12 = vld [vmem:[#allocation14 + $0x8] sm:$0xff]  }
 0x140   :  { %1068 = vmatprep.subr.bf16.mxu0 %v2223_v13  ;;  %v2286_v13 = vld [vmem:[#allocation14 + $0x50] sm:$0xff]  }
 0x143   :  { %1069 = vmatpush1.bf16.msra.mxu0 %v2221_v14  ;;  %v2287_v14 = vld [vmem:[#allocation14 + $0x10] sm:$0xff]  }
 0x144   :  { %1070 = vmatprep.subr.bf16.mxu0 %v2229_v15  ;;  %v2288_v15 = vld [vmem:[#allocation14 + $0x58] sm:$0xff]  }
 0x147   :  { %1071 = vmatpush1.bf16.msra.mxu0 %v2227_v16  ;;  %v2289_v16 = vld [vmem:[#allocation14 + $0x18] sm:$0xff]  }
 0x148   :  { %1072 = vmatprep.subr.bf16.mxu0 %v2235_v17  ;;  %v2290_v17 = vld [vmem:[#allocation14 + $0x60] sm:$0xff]  }
 0x14b   :  { %1073 = vmatpush1.bf16.msra.mxu0 %v2233_v18  ;;  %v2291_v18 = vld [vmem:[#allocation14 + $0x20] sm:$0xff]  }
 0x14c   :  { %1074 = vmatprep.subr.bf16.mxu0 %v2241_v19  ;;  %v2292_v19 = vld [vmem:[#allocation14 + $0x68] sm:$0xff]  }
 0x14f   :  { %1075 = vmatpush1.bf16.msra.mxu0 %v2239_v20  ;;  %v2293_v20 = vld [vmem:[#allocation14 + $0x28] sm:$0xff]  }
 0x152   :  { %1077 = vmatmul.mubr.bf16.vlgmr.msra.gmra.mrb[0].mxu0 %v151_v22  ;;  %v2295_v22 = vld [vmem:[#allocation14 + $0x30] sm:$0xff]  }
 0x1ae   :  { %v955_v25 = vpop.f32.mrb[0].mxu1 }
 0x1af   :  { %v957_v26 = vpop.f32.mrb[1].mxu1 }
 0x1b0   :  { %v959_v27 = vpop.f32.mrb[2].mxu1 }
 0x1b1   :  { %v960_v28 = vpop.f32.mrb[3].mxu1 }
 0x225   :  { %v1078_v29 = vpop.f32.mrb[0].mxu0 }
 0x226   :  { %v2022_v30 = vadd.f32 %v1078_v29, %v955_v25  ;;  %v1080_v31 = vpop.f32.mrb[1].mxu0 }
 0x227   :  { %v2023_v32 = vadd.f32 %v1080_v31, %v957_v26  ;;  %v1082_v33 = vpop.f32.mrb[2].mxu0 }
 0x228   :  { %v1085_v34 = vmax.f32 %v2022_v30, 0.0  ;;  %v1083_v35 = vpop.f32.mrb[3].mxu0 }
 0x229   :  { %v1086_v46 = vmax.f32 %v2023_v32, 0.0 }
 0x22a   :  { %v1087_v38 = vpack.c.bf16 %v1085_v34, %v1085_v34 }
 0x22b   :  { %v1088_v49 = vpack.c.bf16 %v1086_v46, %v1086_v46 }
 0x22c   :  { %1999 = vmatmul.mubr.bf16.vlgmr.msra.gmra.mrb[4].mxu1 %v1087_v38 }
 0x22d   :  { %2003 = vmatpush3.bf16.msra.mxu1 %v2250_v36  ;;  %2018 = vmatprep.mubr.msk.bf16.mxu1 %vm2551_vm0, %v2550_v37 }
 0x22e   :  { %2004 = vmatprep.subr.bf16.mxu1 %v2550_v37 }
 0x231   :  { %2005 = vmatpush3.bf16.msra.mxu1 %v2251_v39 }
 0x232   :  { %2006 = vmatprep.subr.bf16.mxu1 %v2550_v37 }
 0x235   :  { %2007 = vmatpush3.bf16.msra.mxu1 %v2252_v40 }
 0x236   :  { %2008 = vmatprep.subr.bf16.mxu1 %v2550_v37 }
 0x239   :  { %2009 = vmatpush3.bf16.msra.mxu1 %v2253_v41 }
 0x23a   :  { %2010 = vmatprep.subr.bf16.mxu1 %v2550_v37 }
 0x23d   :  { %2011 = vmatpush3.bf16.msra.mxu1 %v2254_v42 }
 0x23e   :  { %2012 = vmatprep.subr.bf16.mxu1 %v2550_v37 }
 0x241   :  { %2013 = vmatpush3.bf16.msra.mxu1 %v2255_v43 }
 0x242   :  { %2014 = vmatprep.subr.bf16.mxu1 %v2550_v37 }
 0x245   :  { %2015 = vmatpush3.bf16.msra.mxu1 %v2256_v44 }
 0x246   :  { %2016 = vmatprep.subr.bf16.mxu1 %v2550_v37  ;;  %v2270_v37 = vld [vmem:[#allocation10 + $0x40] ss:$8 sps:$4 sm:$0xff]  }
 0x249   :  { %2017 = vmatpush3.bf16.msra.mxu1 %v2257_v45 }
 0x24a   :  { %1395 = vmatprep.subr.bf16.mxu1 %v2260_v47 }
 0x24c   :  { %2019 = vmatmul.mubr.bf16.vlgmr.msra.gmra.mrb[8].mxu1 %v1088_v49 }
 0x24d   :  { %1396 = vmatpush1.bf16.msra.mxu1 %v2258_v48  ;;  %1427 = vmatprep.mubr.bf16.mxu1 %v2552_v63  ;;  %v2553_v63 = vmov 1966171168  }
 0x24e   :  { %1397 = vmatprep.subr.bf16.mxu1 %v2263_v50 }
 0x251   :  { %1398 = vmatpush1.bf16.msra.mxu1 %v2261_v51 }
 0x252   :  { %1399 = vmatprep.subr.bf16.mxu1 %v2266_v52 }
 0x255   :  { %1400 = vmatpush1.bf16.msra.mxu1 %v2264_v53 }
 0x256   :  { %1401 = vmatprep.subr.bf16.mxu1 %v2269_v54 }
 0x259   :  { %1402 = vmatpush1.bf16.msra.mxu1 %v2267_v55 }
 0x25a   :  { %1403 = vmatprep.subr.bf16.mxu1 %v2272_v56 }
 0x25d   :  { %1404 = vmatpush1.bf16.msra.mxu1 %v2270_v37 }
 0x25e   :  { %1405 = vmatprep.subr.bf16.mxu1 %v2275_v57 }
 0x261   :  { %1406 = vmatpush1.bf16.msra.mxu1 %v2273_v58 }
 0x262   :  { %1407 = vmatprep.subr.bf16.mxu1 %v2278_v59 }
 0x265   :  { %1408 = vmatpush1.bf16.msra.mxu1 %v2276_v60 }
 0x266   :  { %1409 = vmatprep.subr.bf16.mxu1 %v2281_v61 }
 0x269   :  { %1410 = vmatpush1.bf16.msra.mxu1 %v2279_v62 }
 0x26a   :  { %1960 = vmatprep.subr.bf16.mxu1 %v2282_v9  ;;  %v1469_v9 = vld [vmem:[#allocation11] sm:$0x3] }
 0x2ff   :  { %v1187_v0 = vpop.f32.mrb[4].mxu1 }
 0x300   :  { %v1298_v1 = vpack.c.bf16 %v1187_v0, %v1187_v0  ;;  %v2000_v2 = vpop.f32.mrb[5].mxu1  ;;  %v1478_v0 = vunpack.c.l.s4 %v2553_v63 }
 0x301   :  { %v1190_v3 = vpop.f32.mrb[6].mxu1 }
 0x302   :  { %v2001_v4 = vpop.f32.mrb[7].mxu1  ;;  %1428 = vmatmul.mubr.bf16.vlgmr.msra.gmra.mrb[12].mxu1 %v1298_v1  ;;  %v1480_v1 = vlaneseq  ;;  %v1479_v2 = vunpack.c.0.s8 %v1478_v0 }
 0x303   :  { %1961 = vmatpush3.bf16.msra.mxu1 %v2283_v10 }
 0x304   :  { %1962 = vmatprep.subr.bf16.mxu1 %v2284_v11  ;;  %v1481_v3 = vshrl.u32 %v1480_v1, 7 }
 0x306   :  { %v1497_v11 = vsub.s32 0, %v1481_v3 }
 0x307   :  { %1963 = vmatpush3.bf16.msra.mxu1 %v2285_v12  ;;  %v1501_v12 = vsub.s32 1, %v1481_v3 }
 0x308   :  { %1964 = vmatprep.subr.bf16.mxu1 %v2286_v13 }
 0x30b   :  { %1965 = vmatpush3.bf16.msra.mxu1 %v2287_v14 }
 0x30c   :  { %1966 = vmatprep.subr.bf16.mxu1 %v2288_v15 }
 0x30f   :  { %1967 = vmatpush3.bf16.msra.mxu1 %v2289_v16 }
 0x310   :  { %1968 = vmatprep.subr.bf16.mxu1 %v2290_v17 }
 0x313   :  { %1969 = vmatpush3.bf16.msra.mxu1 %v2291_v18 }
 0x314   :  { %1970 = vmatprep.subr.bf16.mxu1 %v2292_v19 }
 0x317   :  { %1971 = vmatpush3.bf16.msra.mxu1 %v2293_v20 }
 0x318   :  { %1972 = vmatprep.subr.bf16.mxu1 %v2294_v21 }
 0x31b   :  { %1973 = vmatpush3.bf16.msra.mxu1 %v2295_v22  ;;  %v1493_v22 = vld [vmem:[#allocation13] sm:$0x3] }
 0x31c   :  { %1974 = vmatprep.subr.bf16.mxu1 %v2296_v23 }
 0x31f   :  { %v1291_v5 = vpop.f32.mrb[8].mxu1  ;;  %1975 = vmatpush3.bf16.msra.mxu1 %v2297_v24 }
 0x320   :  { %1297 = vst [vmem:[#allocation17] sm:$0xff] %v1291_v5  ;;  %v2020_v6 = vpop.f32.mrb[9].mxu1  ;;  %v1482_v5 = vsub.s32 %v1479_v2, %v1481_v3 }
 0x321   :  { %v1294_v7 = vpop.f32.mrb[10].mxu1 }
 0x322   :  { %v2021_v8 = vpop.f32.mrb[11].mxu1 }
 0x3d5   :  { %v1429_v25 = vpop.f32.mrb[12].mxu1 }
 0x3d6   :  { %v1436_v26 = vrot.slane %v1429_v25, 4  ;;  %v1431_v27 = vpop.f32.mrb[13].mxu1 }
 0x3d7   :  { %v1442_v28 = vrot.slane %v1431_v27, 4  ;;  %v1433_v29 = vpop.f32.mrb[14].mxu1 }
 0x3d8   :  { %v1437_v30 = vadd.f32 %v1436_v26, %v1429_v25  ;;  %v1434_v31 = vpop.f32.mrb[15].mxu1 }
 0x3d9   :  { %v1443_v32 = vadd.f32 %v1442_v28, %v1431_v27 }
 0x3da   :  { %v1438_v33 = vrot.slane %v1437_v30, 2 }
 0x3db   :  { %v1444_v34 = vrot.slane %v1443_v32, 2 }
 0x3dc   :  { %v1439_v35 = vadd.f32 %v1438_v33, %v1437_v30 }
 0x3dd   :  { %v1445_v36 = vadd.f32 %v1444_v34, %v1443_v32 }
 0x3de   :  { %v1440_v38 = vrot.slane %v1439_v35, 1 }
 0x3df   :  { %v1446_v39 = vrot.slane %v1445_v36, 1 }
 0x3e0   :  { %v1441_v40 = vadd.f32 %v1440_v38, %v1439_v35 }
 0x3e1   :  { %v1447_v41 = vadd.f32 %v1446_v39, %v1445_v36 }
 0x3e2   :  { %v1449_v42 = vmul.f32 0.125, %v1441_v40 }
 0x3e3   :  { %v1450_v43 = vmul.f32 0.125, %v1447_v41 }
 0x3e4   :  { %v1451_v44 = vsub.f32 %v1429_v25, %v1449_v42 }
 0x3e5   :  { %v1452_v45 = vsub.f32 %v1431_v27, %v1450_v43 }
 0x3e6   :  { %v1453_v46 = vmul.f32 %v1451_v44, %v1451_v44 }
 0x3e7   :  { %v1454_v47 = vmul.f32 %v1452_v45, %v1452_v45 }
 0x3e8   :  { %v1455_v48 = vrot.slane %v1453_v46, 4 }
 0x3e9   :  { %v1461_v49 = vrot.slane %v1454_v47, 4 }
 0x3ea   :  { %v1456_v50 = vadd.f32 %v1455_v48, %v1453_v46 }
 0x3eb   :  { %v1462_v51 = vadd.f32 %v1461_v49, %v1454_v47 }
 0x3ec   :  { %v1457_v52 = vrot.slane %v1456_v50, 2 }
 0x3ed   :  { %v1463_v53 = vrot.slane %v1462_v51, 2 }
 0x3ee   :  { %v1458_v54 = vadd.f32 %v1457_v52, %v1456_v50 }
 0x3ef   :  { %v1464_v55 = vadd.f32 %v1463_v53, %v1462_v51 }
 0x3f0   :  { %v1459_v56 = vrot.slane %v1458_v54, 1 }
 0x3f1   :  { %v1465_v37 = vrot.slane %v1464_v55, 1 }
 0x3f2   :  { %v1460_v57 = vadd.f32 %v1459_v56, %v1458_v54 }
 0x3f3   :  { %v1466_v58 = vadd.f32 %v1465_v37, %v1464_v55 }
 0x3f4   :  { %v1467_v59 = vmul.f32 0.125, %v1460_v57 }
 0x3f5   :  { %v1468_v60 = vmul.f32 0.125, %v1466_v58 }
 0x3f6   :  { %v1470_v61 = vadd.f32 1e-05, %v1467_v59 }
 0x3f7   :  { %v1471_v62 = vadd.f32 1e-05, %v1468_v60 }
 0x3f8   :  { %2298 = vrsqrt.f32 %v1470_v61 }
 0x3f9   :  { %2300 = vrsqrt.f32 %v1471_v62 }
 0x402   :  { %v2299_v4 = vpop.eup %2298 }
 0x403   :  { %v2301_v6 = vpop.eup %2300 }
 0x404   :  { %v1476_v7 = vcombine.low %v2299_v4, %v2301_v6 }
 0x406   :  { %v1483_v8 = vrot.slane %v1476_v7, %v1482_v5 }
 0x408   :  { %v1490_v10 = vrot.slane %v1483_v8, %v1482_v5 }
 0x40a   :  { %v1492_v13 = vmul.f32 %v1490_v10, %v1469_v9 }
 0x40c   :  { %v1498_v14 = vrot.slane %v1492_v13, %v1497_v11  ;;  %v1502_v15 = vrot.slane %v1492_v13, %v1501_v12 }
 0x40e   :  { %v1505_v16 = vmul.f32 %v1498_v14, %v1449_v42  ;;  %v1506_v17 = vmul.f32 %v1502_v15, %v1450_v43  ;;  %v1527_v18 = vmul.f32 %v1502_v15, %v1431_v27  ;;  %v1526_v19 = vmul.f32 %v1498_v14, %v1429_v25 }
 0x410   :  { %v1509_v20 = vcombine.low %v1505_v16, %v1506_v17 }
 0x412   :  { %v1516_v21 = vrot.slane %v1509_v20, %v1482_v5 }
 0x414   :  { %v1523_v23 = vrot.slane %v1516_v21, %v1482_v5 }
 0x416   :  { %v1525_v24 = vsub.f32 %v1493_v22, %v1523_v23 }
 0x418   :  { %v1536_v26 = vrot.slane %v1525_v24, %v1501_v12  ;;  %v1532_v28 = vrot.slane %v1525_v24, %v1497_v11 }
 0x41a   :  { %v1540_v29 = vadd.f32 %v1536_v26, %v1527_v18  ;;  %v1539_v30 = vadd.f32 %v1532_v28, %v1526_v19 }
 0x41c   :  { %v1542_v31 = vmax.f32 %v1540_v29, 0.0  ;;  %v1541_v32 = vmax.f32 %v1539_v30, 0.0 }
 0x41e   :  { %v1544_v33 = vpack.c.bf16 %v1542_v31, %v1542_v31  ;;  %v1543_v34 = vpack.c.bf16 %v1541_v32, %v1541_v32 }
 0x420   :  { %1705 = vmatprep.mubr.bf16.mxu1 %v1544_v33 }
 0x421   :  { %1706 = vmatmul.mubr.bf16.vlgmr.msra.gmra.mrb[16].mxu1 %v1543_v34 }
 0x422   :  { %2491 = shalt.err (!%p2488_p12)
}
 0x423   :  { %s2492_s12 = scalar_lea.hbm %s2770_s9, 128 }
 0x424   :  { %p2493_p13 = scmp.ne.s32.totalorder %s2770_s9, %s2492_s12  ;;  %p2496_p0 = scmp.lt.u32.totalorder %s2492_s12, %s2770_s9 }
 0x426   :  { %p2498_p1 = pnand %p2496_p0, %p2493_p13 }
 0x428   :  { %2501 = shalt.err (!%p2498_p1)
}
 0x429   :  { %1752 = dma.vmem_to_hbm [thread:$0]  %s1750_s10, 128, %s2770_s9, [#allocation18]  }
 0x42a   :  { %s2555_s9 = smov [#allocation16]  }
 0x42b   :  { %s1739_s11 = sshll.u32 %s2555_s9, 4  ;;  %s1740_s11 = int_to_ptr.vmem [resolvable:$true] %s1739_s11 }
 0x42c   :  { %s2502_s0 = scalar_lea.vmem %s1740_s11, 128  ;;  %p2507_p3 = scmp.lt.s32.totalorder %s1740_s11, %s1740_s11 }
 0x42d   :  { %p2503_p2 = scmp.ne.s32.totalorder %s1740_s11, %s2502_s0  ;;  %p2508_p4 = scmp.lt.s32.totalorder %s2502_s0, %s2502_s0 }
 0x42f   :  { %p2509_p5 = por %p2508_p4, %p2507_p3 }
 0x431   :  { %p2510_p6 = pnand %p2509_p5, %p2503_p2 }
 0x4f4   :  { %v1976_v25 = vpop.f32.mrb[16].mxu1 }
 0x4f5   :  { %v1977_v27 = vpop.f32.mrb[17].mxu1 }
 0x4f6   :  { %v1978_v35 = vadd.f32 %v1977_v27, %v1976_v25  ;;  %v1979_v36 = vpop.f32.mrb[18].mxu1 }
 0x4f7   :  { %v1980_v38 = vpop.f32.mrb[19].mxu1 }
 0x4f8   :  { %v1713_v39 = vrot.slane %v1978_v35, 4 }
 0x4fa   :  { %v1714_v40 = vadd.f32 %v1978_v35, %v1713_v39 }
 0x4fc   :  { %v1715_v41 = vrot.slane %v1714_v40, 2 }
 0x4fe   :  { %v1716_v42 = vadd.f32 %v1715_v41, %v1714_v40 }
 0x500   :  { %v1717_v43 = vrot.slane %v1716_v42, 1 }
 0x502   :  { %v1718_v44 = vadd.f32 %v1717_v43, %v1716_v42 }
 0x504   :  { %v1719_v45 = vmul.f32 0.125, %v1718_v44 }
 0x506   :  { %v1720_v46 = vsub.f32 %v1978_v35, %v1719_v45 }
 0x508   :  { %v1721_v47 = vmul.f32 %v1720_v46, %v1720_v46 }
 0x50a   :  { %v1722_v48 = vrot.slane %v1721_v47, 4 }
 0x50c   :  { %v1723_v49 = vadd.f32 %v1722_v48, %v1721_v47 }
 0x50e   :  { %v1724_v50 = vrot.slane %v1723_v49, 2 }
 0x510   :  { %v1725_v51 = vadd.f32 %v1724_v50, %v1723_v49 }
 0x512   :  { %v1726_v52 = vrot.slane %v1725_v51, 1 }
 0x514   :  { %v1727_v53 = vadd.f32 %v1726_v52, %v1725_v51 }
 0x516   :  { %v1728_v54 = vmul.f32 0.125, %v1727_v53 }
 0x518   :  { %v1729_v55 = vadd.f32 1e-05, %v1728_v54 }
 0x51a   :  { %2302 = vrsqrt.f32 %v1729_v55 }
 0x524   :  { %v2303_v56 = vpop.eup %2302 }
 0x525   :  { %v1731_v37 = vmul.f32 %v2303_v56, %v1720_v46 }
 0x527   :  { %1732 = vst [vmem:[#allocation16] sm:$0xff] %v1731_v37 }
 0x528   :  { %2513 = shalt.err (!%p2510_p6)
}
 0x529   :  { %s2514_s19 = scalar_lea.hbm %s2769_s8, 128 }
 0x52a   :  { %p2515_p7 = scmp.ne.s32.totalorder %s2769_s8, %s2514_s19  ;;  %p2518_p8 = scmp.lt.u32.totalorder %s2514_s19, %s2769_s8 }
 0x52c   :  { %p2520_p9 = pnand %p2518_p8, %p2515_p7 }
 0x52e   :  { %2523 = shalt.err (!%p2520_p9)
}
 0x52f   :  { %1742 = dma.vmem_to_hbm [thread:$0]  %s1740_s11, 128, %s2769_s8, [#allocation4]  }
 0x530   :  { %2534 = dma.done.wait [#allocation4], 128  }
 0x531   :  { %2535 = vsyncadd [#allocation4], 4294967168 }
 0x532   :  { %2536 = dma.done.wait [#allocation18], 128  }
 0x533   :  { %2537 = vsyncadd [#allocation18], 4294967168 }
 0x534   :  { %1759 = vsyncpa [#allocation3], 1 }
 0x535   :  { %1760 = vsyncpa [#allocation6], 1 }
 0x536   :  { %1761 = vsyncpa [#allocation9], 1 }
 0x537   :  { %1762 = vsyncpa [#allocation12], 1 }
 0x538   :  { %1763 = vsyncpa [#allocation15], 1 }
 0x539   :  { %1764 = vsyncpa [#allocation4], 1 }
 0x53a   :  { %1765 = vsyncpa [#allocation18], 1 }

</bundles_post_ra>
